<compile_context>
chip_gen: v5e
topology: v5e:2x2
jax: 0.10.0
libtpu: 0.0.40
codegen_flags: <defaults>
</compile_context>

<pallas_src>
import math
from functools import partial

import jax
import jax.numpy as jnp
from jax import lax
from jax.experimental import pallas as pl
from jax.experimental.pallas import tpu as pltpu


# ----------------------------- structure parsing -----------------------------
def parse_structure(structure: str):
    """Mirror of BaseModel.parse_structure (pure Python, no compute)."""
    n_layers, sizes = [], []
    for block in structure.split(","):
        n_l, size = block.split("x")
        n_layers.append(int(n_l))
        sizes.append(int(size))
    return n_layers, sizes


# ------------------------------- Pallas kernel --------------------------------
def _act_kernel(x_ref, o_ref, *, act_fun_name: str):
    x = x_ref[...]
    if act_fun_name == "gelu":
        # Exact (erf-based) GELU — matches torch.nn.GELU() default
        # (approximate='none').  Compute in f32 for numerical fidelity.
        xf = x.astype(jnp.float32)
        y = 0.5 * xf * (1.0 + lax.erf(xf * (1.0 / math.sqrt(2.0))))
        o_ref[...] = y.astype(o_ref.dtype)
    elif act_fun_name == "relu":
        # Native-dtype compute: no upcast needed for max(x, 0).
        o_ref[...] = jnp.maximum(x, jnp.zeros((), x.dtype))
    elif act_fun_name == "none":
        o_ref[...] = x
    else:
        raise ValueError(f"unknown act_fun {act_fun_name}")


def apply_act_fun(x: jnp.ndarray, act_fun_name: str) -> jnp.ndarray:
    """Apply BaseModel's act_fun elementwise via a Pallas TPU kernel.

    The input (any shape) is flattened to a lane-dense (rows, 512) slab,
    padded up to whole (block_rows, 512) tiles, processed with a 1D parallel
    row-tile grid, then un-padded and reshaped back.
    """
    if act_fun_name == "none":
        # Identity: skip the HBM round trip + kernel launch entirely.
        return x

    orig_shape = x.shape
    dtype = x.dtype
    total = int(x.size)
    if total == 0:
        return x

    LANES = 512                     # lane-dense row width (multiple of 128)
    MAX_BLOCK_ROWS = 1024           # 1024 x 512 f32 = 2 MiB / block buffer

    rows_needed = -(-total // LANES)
    block_rows = min(MAX_BLOCK_ROWS, max(8, ((rows_needed + 7) // 8) * 8))
    n_tiles = -(-rows_needed // block_rows)
    rows_padded = n_tiles * block_rows

    xf = x.reshape(-1)
    pad = rows_padded * LANES - total
    if pad:
        xf = jnp.concatenate([xf, jnp.zeros((pad,), dtype=dtype)])
    x2 = xf.reshape(rows_padded, LANES)

    kernel = partial(_act_kernel, act_fun_name=act_fun_name)
    y2 = pl.pallas_call(
        kernel,
        out_shape=jax.ShapeDtypeStruct((rows_padded, LANES), dtype),
        grid=(n_tiles,),
        in_specs=[pl.BlockSpec((block_rows, LANES), lambda r: (r, 0))],
        out_specs=pl.BlockSpec((block_rows, LANES), lambda r: (r, 0)),
        compiler_params=pltpu.CompilerParams(
            dimension_semantics=("parallel",)
        ),
    )(x2)

    y = y2.reshape(-1)
    if pad:
        y = y[:total]
    return y.reshape(orig_shape)


# --------------------------------- BaseModel ----------------------------------
class BaseModelJAX:
    """JAX/Pallas mirror of the PyTorch BaseModel (abstract base, no weights)."""

    def __init__(
        self,
        d_model: int,
        vocab_size: int,
        structure: str,
        num_heads: int,
        method_params,
        apply_rotary_pos_enc: bool,
        dropout: float,
        act_fun: str,
        post_norm: bool,
        pos_enc_type: str,
        use_embedding: bool,
        hourglass_downsampling_type: str,
        hourglass_upsampling_type: str,
        hourglass_attention_downsampling: bool,
        hourglass_attention_upsampling: bool,
        hourglass_upsampling_residual: bool,
        hourglass_sampling_post_norm: bool,
        hourglass_sampling_use_linear: bool,
        hourglass_sampling_use_feedforward: bool,
        device: str,
    ):
        self.d_model = d_model
        self.vocab_size = vocab_size
        self.structure = structure
        self.num_heads = num_heads
        self.method_params = method_params
        self.apply_rotary_pos_enc = apply_rotary_pos_enc
        self.dropout = dropout
        self.pos_enc_type = pos_enc_type
        self.act_fun_name = act_fun
        self.post_norm = post_norm
        self.use_embedding = use_embedding
        self.hourglass_attention_downsampling = hourglass_attention_downsampling
        self.hourglass_attention_upsampling = hourglass_attention_upsampling
        self.hourglass_upsampling_residual = hourglass_upsampling_residual
        self.hourglass_downsampling_type = hourglass_downsampling_type
        self.hourglass_upsampling_type = hourglass_upsampling_type
        self.hourglass_sampling_post_norm = hourglass_sampling_post_norm
        self.hourglass_sampling_use_linear = hourglass_sampling_use_linear
        self.hourglass_sampling_use_feedforward = hourglass_sampling_use_feedforward
        self.device = device
        self.n_layers, self.sizes = parse_structure(structure)

    # act_fun as a Pallas kernel (the only concrete compute defined in __init__)
    def act_fun(self, x: jnp.ndarray) -> jnp.ndarray:
        return apply_act_fun(x, self.act_fun_name)

    def forward(self, x: jnp.ndarray):
        # Abstract in the reference; only act_fun is concretely defined compute.
        raise NotImplementedError

    def get_hyperparams(self):
        return {
            "structure": self.structure,
            "vocab_size": self.vocab_size,
            "use_embedding": self.use_embedding,
            "embedder_type": "learnable",
            "pos_enc_type": self.pos_enc_type,
            "number_of_params": 0,  # base class has no parameters
            "device": self.device,
            "downsampling_type": self.hourglass_downsampling_type,
            "upsampling_type": self.hourglass_upsampling_type,
            "attention_downsampling": self.hourglass_attention_downsampling,
            "attention_upsampling": self.hourglass_attention_upsampling,
            "upsampling_residual": self.hourglass_upsampling_residual,
            "sampling_post_norm": self.hourglass_sampling_post_norm,
            "sampling_use_linear": self.hourglass_sampling_use_linear,
            "sampling_use_feedforward": self.hourglass_sampling_use_feedforward,
            "mha_type": self.method_params.get("method", "vanilla"),
            "d_model": self.d_model,
            "num_heads": self.num_heads,
            "dropout": self.dropout,
            "act_fun": self.act_fun_name,
            "apply_rotary_pos_enc": self.apply_rotary_pos_enc,
            "post_norm": self.post_norm,
        }


# ------------------------------------ main -------------------------------------
if __name__ == "__main__":
    d_model = 32
    batch, seq = 2, 8

    def make_model(act):
        return BaseModelJAX(
            d_model=d_model,
            vocab_size=64,
            structure="2x32,1x32",
            num_heads=4,
            method_params={"method": "vanilla"},
            apply_rotary_pos_enc=False,
            dropout=0.0,
            act_fun=act,
            post_norm=False,
            pos_enc_type="learnable",
            use_embedding=False,
            hourglass_downsampling_type="avg",
            hourglass_upsampling_type="linear",
            hourglass_attention_downsampling=False,
            hourglass_attention_upsampling=False,
            hourglass_upsampling_residual=False,
            hourglass_sampling_post_norm=False,
            hourglass_sampling_use_linear=False,
            hourglass_sampling_use_feedforward=False,
            device="tpu",
        )

    key = jax.random.PRNGKey(0)
    x = jax.random.normal(key, (batch, seq, d_model), dtype=jnp.float32)

    # GELU path (exact, erf-based)
    y_gelu = jax.block_until_ready(make_model("gelu").act_fun(x))
    ref_gelu = jax.nn.gelu(x, approximate=False)
    assert y_gelu.shape == x.shape and y_gelu.dtype == x.dtype
    assert jnp.allclose(y_gelu, ref_gelu, atol=1e-5), "mismatch vs exact GELU"

    # ReLU path
    y_relu = jax.block_until_ready(make_model("relu").act_fun(x))
    assert jnp.allclose(y_relu, jnp.maximum(x, 0.0)), "mismatch vs ReLU"

    # Identity path (short-circuit, no kernel)
    y_none = jax.block_until_ready(make_model("none").act_fun(x))
    assert jnp.allclose(y_none, x), "mismatch vs identity"

    print("KERNEL_OK")
</pallas_src>

<mosaic_0001>
module attributes {stable_mosaic.version = 11 : i64} {
  func.func @_act_kernel(%arg0: i32, %arg1: memref<8x512xf32, #tpu.memory_space<vmem>>, %arg2: memref<8x512xf32, #tpu.memory_space<vmem>>) attributes {dimension_semantics = [#tpu.dimension_semantics<parallel>], iteration_bounds = array<i64: 1>, scalar_prefetch = 0 : i64, scratch_operands = 0 : i64, tpu.core_type = #tpu.core_type<tc>, window_params = [{transform_indices = @transform_0, window_bounds = array<i64: 8, 512>}, {transform_indices = @transform_1, window_bounds = array<i64: 8, 512>}]} {
    %c0 = arith.constant 0 : index
    %c0_0 = arith.constant 0 : index
    %0 = vector.load %arg1[%c0, %c0_0] : memref<8x512xf32, #tpu.memory_space<vmem>>, vector<8x512xf32>
    %cst = arith.constant 5.000000e-01 : f32
    %1 = vector.broadcast %cst : f32 to vector<8x512xf32>
    %2 = arith.mulf %1, %0 : vector<8x512xf32>
    %cst_1 = arith.constant 0.707106769 : f32
    %3 = vector.broadcast %cst_1 : f32 to vector<8x512xf32>
    %4 = arith.mulf %0, %3 : vector<8x512xf32>
    %5 = math.erf %4 : vector<8x512xf32>
    %cst_2 = arith.constant 1.000000e+00 : f32
    %6 = vector.broadcast %cst_2 : f32 to vector<8x512xf32>
    %7 = arith.addf %6, %5 : vector<8x512xf32>
    %8 = arith.mulf %2, %7 : vector<8x512xf32>
    %c0_3 = arith.constant 0 : index
    %c0_4 = arith.constant 0 : index
    %9 = vector.load %arg2[%c0_3, %c0_4] : memref<8x512xf32, #tpu.memory_space<vmem>>, vector<8x512xf32>
    tpu.vector_store %arg2[%c0_3, %c0_4], %8 {strides = array<i32>} : memref<8x512xf32, #tpu.memory_space<vmem>>, vector<8x512xf32>,
    return
  }
  func.func @transform_0(%arg0: i32) -> (i32, i32) {
    %c0_i32 = arith.constant 0 : i32
    %c0_i32_0 = arith.constant 0 : i32
    return %arg0, %c0_i32 : i32, i32
  }
  func.func @transform_1(%arg0: i32) -> (i32, i32) {
    %c0_i32 = arith.constant 0 : i32
    %c0_i32_0 = arith.constant 0 : i32
    return %arg0, %c0_i32 : i32, i32
  }
}

</mosaic_0001>

<bundles_post_ra>
// kernel: tpu_custom_call.1
= control target key start
LH: loop header
LB: loop body
LE: loop exit
PB: predicated region body
PF: predicated region fallthrough
CT: control target
= control target key end

     0   :  { %6 = vsyncpa [#allocation3], 0  ;;  %s417_s0 = inlined_call_operand.hbm [shape: f32[8,512], index: 0, kind: input, shape index: {}]   ;;  %s418_s1 = inlined_call_operand.hbm [shape: f32[8,512], index: 1, kind: output, shape index: {}]  }
   0x1   :  { %7 = vsyncpa [#allocation4], 0  ;;  %s13_s8 = sshll.u32 %s417_s0, 4  ;;  %s290_s9 = smov [#allocation2]   ;;  %s14_s8 = int_to_ptr.hbm [resolvable:$true] %s13_s8 }
   0x2   :  { %s15_s10 = sshll.u32 %s290_s9, 4  ;;  %s16_s10 = int_to_ptr.vmem [resolvable:$true] %s15_s10 }
   0x3   :  { %18 = dma.hbm_to_vmem [thread:$0]  %s14_s8, 512, %s16_s10, [#allocation3]  }
   0x4   :  { %286 = dma.done.wait [#allocation3], 512  }
   0x5   :  { %287 = vsyncadd [#allocation3], 4294966784  ;;  %v305_v0 = vld [vmem:[#allocation2] sm:$0xff]  ;;  %v307_v1 = vld [vmem:[#allocation2 + $0x8] sm:$0xff]  ;;  %s291_s0 = smov [#allocation5]   ;;  %s214_s14 = sshll.u32 %s418_s1, 4  ;;  %s215_s14 = int_to_ptr.hbm [resolvable:$true] %s214_s14 }
   0x6   :  { %v309_v2 = vld [vmem:[#allocation2 + $0x10] sm:$0xff]  ;;  %v312_v3 = vmul.f32 0.70710677, %v305_v0  ;;  %v315_v4 = vmul.f32 0.70710677, %v307_v1  ;;  %v317_v5 = vld [vmem:[#allocation2 + $0x18] sm:$0xff] }
   0x7   :  { %v320_v6 = vmul.f32 0.70710677, %v309_v2  ;;  %v323_v7 = vmul.f32 0.70710677, %v317_v5  ;;  %s212_s11 = sshll.u32 %s291_s0, 4  ;;  %s213_s11 = int_to_ptr.vmem [resolvable:$true] %s212_s11 }
   0x8   :  { %v35_v8 = vmul.f32 %v312_v3, %v312_v3  ;;  %v75_v9 = vmul.f32 %v315_v4, %v315_v4 }
   0x9   :  { %v115_v10 = vmul.f32 %v320_v6, %v320_v6  ;;  %v155_v11 = vmul.f32 %v323_v7, %v323_v7 }
   0xa   :  { %v333_v12 = vmin.f32 %v35_v8, 16.0  ;;  %v335_v13 = vmin.f32 %v75_v9, 16.0 }
   0xb   :  { %v337_v14 = vmin.f32 %v115_v10, 16.0  ;;  %v339_v15 = vmin.f32 %v155_v11, 16.0 }
   0xc   :  { %v37_v16 = vmul.f32 2.1237322e-06, %v333_v12  ;;  %v48_v17 = vmul.f32 3.8918573e-05, %v333_v12  ;;  %v77_v18 = vmul.f32 2.1237322e-06, %v335_v13 }
   0xd   :  { %v88_v19 = vmul.f32 3.8918573e-05, %v335_v13  ;;  %v117_v20 = vmul.f32 2.1237322e-06, %v337_v14  ;;  %v128_v21 = vmul.f32 3.8918573e-05, %v337_v14 }
   0xe   :  { %v38_v22 = vadd.f32 0.00028619796, %v37_v16  ;;  %v49_v23 = vadd.f32 0.001143296, %v48_v17  ;;  %v78_v24 = vadd.f32 0.00028619796, %v77_v18 }
   0xf   :  { %v89_v25 = vadd.f32 0.001143296, %v88_v19  ;;  %v118_v26 = vadd.f32 0.00028619796, %v117_v20  ;;  %v129_v27 = vadd.f32 0.001143296, %v128_v21 }
  0x10   :  { %v39_v28 = vmul.f32 %v38_v22, %v333_v12  ;;  %v50_v29 = vmul.f32 %v49_v23, %v333_v12  ;;  %v79_v30 = vmul.f32 %v78_v24, %v335_v13  ;;  %v157_v31 = vmul.f32 2.1237322e-06, %v339_v15 }
  0x11   :  { %v90_v32 = vmul.f32 %v89_v25, %v335_v13  ;;  %v119_v33 = vmul.f32 %v118_v26, %v337_v14  ;;  %v130_v34 = vmul.f32 %v129_v27, %v337_v14  ;;  %v168_v48 = vmul.f32 3.8918573e-05, %v339_v15 }
  0x12   :  { %v40_v35 = vadd.f32 0.0036580483, %v39_v28  ;;  %v51_v36 = vadd.f32 0.014752088, %v50_v29  ;;  %v80_v37 = vadd.f32 0.0036580483, %v79_v30 }
  0x13   :  { %v91_v38 = vadd.f32 0.014752088, %v90_v32  ;;  %v120_v39 = vadd.f32 0.0036580483, %v119_v33  ;;  %v131_v40 = vadd.f32 0.014752088, %v130_v34 }
  0x14   :  { %v41_v41 = vmul.f32 %v40_v35, %v333_v12  ;;  %v52_v42 = vmul.f32 %v51_v36, %v333_v12  ;;  %v81_v43 = vmul.f32 %v80_v37, %v335_v13  ;;  %v158_v44 = vadd.f32 0.00028619796, %v157_v31 }
  0x15   :  { %v92_v45 = vmul.f32 %v91_v38, %v335_v13  ;;  %v121_v46 = vmul.f32 %v120_v39, %v337_v14  ;;  %v132_v47 = vmul.f32 %v131_v40, %v337_v14  ;;  %v169_v60 = vadd.f32 0.001143296, %v168_v48 }
  0x16   :  { %v42_v49 = vadd.f32 0.05243302, %v41_v41  ;;  %v53_v50 = vadd.f32 0.112945676, %v52_v42  ;;  %v82_v51 = vadd.f32 0.05243302, %v81_v43  ;;  %v159_v52 = vmul.f32 %v158_v44, %v339_v15 }
  0x17   :  { %v93_v53 = vadd.f32 0.112945676, %v92_v45  ;;  %v122_v54 = vadd.f32 0.05243302, %v121_v46  ;;  %v133_v57 = vadd.f32 0.112945676, %v132_v47  ;;  %v170_v19 = vmul.f32 %v169_v60, %v339_v15 }
  0x18   :  { %v43_v55 = vmul.f32 %v42_v49, %v333_v12  ;;  %v54_v56 = vmul.f32 %v53_v50, %v333_v12  ;;  %v83_v58 = vmul.f32 %v82_v51, %v335_v13  ;;  %v160_v8 = vadd.f32 0.0036580483, %v159_v52 }
  0x19   :  { %v94_v59 = vmul.f32 %v93_v53, %v335_v13  ;;  %v123_v62 = vmul.f32 %v122_v54, %v337_v14  ;;  %v134_v63 = vmul.f32 %v133_v57, %v337_v14  ;;  %v171_v25 = vadd.f32 0.014752088, %v170_v19 }
  0x1a   :  { %v55_v61 = vadd.f32 0.4994258, %v54_v56  ;;  %v44_v10 = vadd.f32 0.18741608, %v43_v55  ;;  %v84_v17 = vadd.f32 0.18741608, %v83_v58  ;;  %v161_v22 = vmul.f32 %v160_v8, %v339_v15 }
  0x1b   :  { %v95_v9 = vadd.f32 0.4994258, %v94_v59  ;;  %v135_v16 = vadd.f32 0.4994258, %v134_v63  ;;  %v124_v21 = vadd.f32 0.18741608, %v123_v62  ;;  %v172_v31 = vmul.f32 %v171_v25, %v339_v15 }
  0x1c   :  { %v56_v11 = vmul.f32 %v55_v61, %v333_v12  ;;  %v45_v26 = vmul.f32 %v44_v10, %v333_v12  ;;  %v85_v27 = vmul.f32 %v84_v17, %v335_v13  ;;  %v162_v29 = vadd.f32 0.05243302, %v161_v22 }
  0x1d   :  { %v96_v18 = vmul.f32 %v95_v9, %v335_v13  ;;  %v136_v24 = vmul.f32 %v135_v16, %v337_v14  ;;  %v125_v28 = vmul.f32 %v124_v21, %v337_v14  ;;  %v173_v37 = vadd.f32 0.112945676, %v172_v31 }
  0x1e   :  { %v57_v20 = vadd.f32 1.0, %v56_v11  ;;  %v46_v32 = vadd.f32 1.1283791, %v45_v26  ;;  %v86_v33 = vadd.f32 1.1283791, %v85_v27  ;;  %v163_v36 = vmul.f32 %v162_v29, %v339_v15 }
  0x1f   :  { %v97_v23 = vadd.f32 1.0, %v96_v18  ;;  %v137_v30 = vadd.f32 1.0, %v136_v24  ;;  %v126_v35 = vadd.f32 1.1283791, %v125_v28  ;;  %v174_v43 = vmul.f32 %v173_v37, %v339_v15 }
  0x20   :  { %230 = vrcp.f32 %v57_v20  ;;  %v67_v39 = vand.u32 2147483647, %v57_v20  ;;  %v69_v40 = vand.u32 2147483648, %v57_v20  ;;  %v47_v41 = vmul.f32 %v46_v32, %v312_v3 }
  0x21   :  { %232 = vrcp.f32 %v97_v23  ;;  %v107_v13 = vand.u32 2147483647, %v97_v23  ;;  %v109_v42 = vand.u32 2147483648, %v97_v23  ;;  %vm63_vm0 = vweird.f32 %v57_v20 }
  0x22   :  { %234 = vrcp.f32 %v137_v30  ;;  %v87_v45 = vmul.f32 %v86_v33, %v315_v4  ;;  %vm103_vm2 = vweird.f32 %v97_v23  ;;  %v175_v47 = vadd.f32 0.4994258, %v174_v43 }
  0x23   :  { %vm381_vm4 = vcmp.eq.f32.partialorder %v67_v39, 8.507059e+37  ;;  %v70_v3 = vor.u32 1.1754944e-38, %v69_v40  ;;  %vm385_vm5 = vcmp.eq.f32.partialorder %v107_v13, 8.507059e+37  ;;  %v110_v53 = vor.u32 1.1754944e-38, %v109_v42 }
  0x24   :  { %v176_v55 = vmul.f32 %v175_v47, %v339_v15  ;;  %vm143_vm8 = vweird.f32 %v137_v30  ;;  %v147_v58 = vand.u32 2147483647, %v137_v30  ;;  %v149_v59 = vand.u32 2147483648, %v137_v30 }
  0x25   :  { %v164_v8 = vadd.f32 0.18741608, %v163_v36  ;;  %v27_v22 = vmul.f32 0.5, %v305_v0  ;;  %v28_v24 = vmul.f32 0.5, %v307_v1  ;;  %v30_v43 = vmul.f32 0.5, %v317_v5 }
  0x26   :  { %v231_v34 = vpop.eup %230  ;;  %v177_v62 = vadd.f32 1.0, %v176_v55  ;;  %v150_v18 = vor.u32 1.1754944e-38, %v149_v59  ;;  %vm148_vm11 = vcmp.eq.f32.partialorder %v147_v58, 8.507059e+37 }
  0x27   :  { %v233_v38 = vpop.eup %232  ;;  %v59_v12 = vmul.f32 %v231_v34, %v57_v20  ;;  %vm64_vm1 = vweird.f32 %v231_v34  ;;  %v127_v20 = vmul.f32 %v126_v35, %v320_v6  ;;  %v165_v27 = vmul.f32 %v164_v8, %v339_v15 }
  0x28   :  { %v99_v14 = vmul.f32 %v233_v38, %v97_v23  ;;  %vm104_vm3 = vweird.f32 %v233_v38  ;;  %v235_v48 = vpop.eup %234  ;;  %vm389_vm6 = vmor %vm63_vm0, %vm64_vm1  ;;  %236 = vrcp.f32 %v177_v62  ;;  %v189_v0 = vand.u32 2147483648, %v177_v62 }
  0x29   :  { %v60_v44 = vsub.f32 1.0, %v59_v12  ;;  %v139_v54 = vmul.f32 %v235_v48, %v137_v30  ;;  %vm394_vm7 = vmor %vm103_vm2, %vm104_vm3  ;;  %vm144_vm9 = vweird.f32 %v235_v48  ;;  %v166_v37 = vadd.f32 1.1283791, %v165_v27 }
  0x2a   :  { %v100_v46 = vsub.f32 1.0, %v99_v14  ;;  %vm145_vm10 = vmor %vm143_vm8, %vm144_vm9  ;;  %vm183_vm12 = vweird.f32 %v177_v62  ;;  %v187_v1 = vand.u32 2147483647, %v177_v62  ;;  %v190_v40 = vor.u32 1.1754944e-38, %v189_v0 }
  0x2b   :  { %v61_v49 = vmul.f32 %v231_v34, %v60_v44  ;;  %v140_v61 = vsub.f32 1.0, %v139_v54  ;;  %v167_v13 = vmul.f32 %v166_v37, %v323_v7 }
  0x2c   :  { %v101_v4 = vmul.f32 %v233_v38, %v100_v46  ;;  %vm188_vm15 = vcmp.eq.f32.partialorder %v187_v1, 8.507059e+37 }
  0x2d   :  { %v62_v56 = vadd.f32 %v231_v34, %v61_v49  ;;  %v141_v11 = vmul.f32 %v235_v48, %v140_v61 }
  0x2e   :  { %v102_v60 = vadd.f32 %v233_v38, %v101_v4  ;;  %v237_v31 = vpop.eup %236 }
  0x2f   :  { %v66_v63 = vsel %vm389_vm6, %v231_v34, %v62_v56  ;;  %v142_v21 = vadd.f32 %v235_v48, %v141_v11  ;;  %v29_v34 = vmul.f32 0.5, %v309_v2  ;;  %v179_v6 = vmul.f32 %v237_v31, %v177_v62 }
  0x30   :  { %v71_v9 = vsel %vm381_vm4, %v70_v3, %v66_v63  ;;  %v106_v10 = vsel %vm394_vm7, %v233_v38, %v102_v60  ;;  %vm184_vm13 = vweird.f32 %v237_v31 }
  0x31   :  { %v72_v16 = vmul.f32 %v71_v9, %v47_v41  ;;  %v111_v17 = vsel %vm385_vm5, %v110_v53, %v106_v10  ;;  %v146_v26 = vsel %vm145_vm10, %v235_v48, %v142_v21  ;;  %v180_v38 = vsub.f32 1.0, %v179_v6  ;;  %vm185_vm14 = vmor %vm183_vm12, %vm184_vm13 }
  0x32   :  { %v112_v19 = vmul.f32 %v111_v17, %v87_v45  ;;  %v151_v29 = vsel %vm148_vm11, %v150_v18, %v146_v26 }
  0x33   :  { %v224_v23 = vclamps-f32 %v72_v16, 1.0  ;;  %v152_v32 = vmul.f32 %v151_v29, %v127_v20  ;;  %v181_v12 = vmul.f32 %v237_v31, %v180_v38 }
  0x34   :  { %v225_v25 = vclamps-f32 %v112_v19, 1.0 }
  0x35   :  { %v195_v28 = vadd.f32 1.0, %v224_v23  ;;  %v226_v36 = vclamps-f32 %v152_v32, 1.0  ;;  %v182_v41 = vadd.f32 %v237_v31, %v181_v12 }
  0x36   :  { %v196_v30 = vadd.f32 1.0, %v225_v25 }
  0x37   :  { %v199_v33 = vmul.f32 %v195_v28, %v27_v22  ;;  %v197_v15 = vadd.f32 1.0, %v226_v36  ;;  %v186_v2 = vsel %vm185_vm14, %v237_v31, %v182_v41 }
  0x38   :  { %v200_v35 = vmul.f32 %v196_v30, %v28_v24  ;;  %v191_v14 = vsel %vm188_vm15, %v190_v40, %v186_v2 }
  0x39   :  { %203 = vst [vmem:[#allocation5] sm:$0xff] %v199_v33  ;;  %v201_v39 = vmul.f32 %v197_v15, %v29_v34  ;;  %v192_v42 = vmul.f32 %v191_v14, %v167_v13 }
  0x3a   :  { %204 = vst [vmem:[#allocation5 + $0x8] sm:$0xff] %v200_v35 }
  0x3b   :  { %205 = vst [vmem:[#allocation5 + $0x10] sm:$0xff] %v201_v39  ;;  %v227_v44 = vclamps-f32 %v192_v42, 1.0 }
  0x3d   :  { %v198_v45 = vadd.f32 1.0, %v227_v44 }
  0x3f   :  { %v202_v46 = vmul.f32 %v198_v45, %v30_v43 }
  0x41   :  { %206 = vst [vmem:[#allocation5 + $0x18] sm:$0xff] %v202_v46 }
  0x42   :  { %217 = dma.vmem_to_hbm [thread:$0]  %s213_s11, 512, %s215_s14, [#allocation4]  }
  0x43   :  { %288 = dma.done.wait [#allocation4], 512  }
  0x44   :  { %289 = vsyncadd [#allocation4], 4294966784 }
  0x45   :  { %222 = vsyncpa [#allocation3], 1 }
  0x46   :  { %223 = vsyncpa [#allocation4], 1 }

</bundles_post_ra>
